<compile_context>
chip_gen: v6e
topology: v6e:2x2x1
jax: 0.10.0
libtpu: 0.0.40
codegen_flags: <defaults>
</compile_context>

<pallas_src>
import functools

import jax
import jax.numpy as jnp
from jax.experimental import pallas as pl
from jax.experimental.pallas import tpu as pltpu


_GELU_C1 = 0.7978845608028654              # sqrt(2/pi)
_GELU_C2 = 0.7978845608028654 * 0.044715   # sqrt(2/pi) * 0.044715


def _gelu_new(h):
    # GPT-2 "gelu_new": 0.5*x*(1+tanh(sqrt(2/pi)*(x+0.044715*x^3))), constants folded.
    return 0.5 * h * (1.0 + jnp.tanh(h * (_GELU_C1 + _GELU_C2 * h * h)))


# ----------------------------------------------------------------------------
# Kernels
# ----------------------------------------------------------------------------

def _mlp_resident_kernel(x_ref, wfc_ref, bfc_ref, wproj_ref, bproj_ref, o_ref, *, ti):
    """Weights fully VMEM-resident. Grid = (M // tm,). Inner static loop over I chunks."""
    x = x_ref[...].astype(jnp.bfloat16)          # in-kernel cast (f32 HBM -> bf16 MXU)
    intermediate = wfc_ref.shape[1]
    out_features = wproj_ref.shape[1]

    acc = jnp.zeros((x.shape[0], out_features), jnp.float32)
    # Static Python loop: n_chunks is a small trace-time constant; the static
    # ref slices are cheap views, so the full (tm, I) f32 intermediate never
    # materializes.
    for ci in range(intermediate // ti):
        lo = ci * ti
        h = jnp.dot(x, wfc_ref[:, lo:lo + ti], preferred_element_type=jnp.float32)
        h = _gelu_new(h + bfc_ref[:, lo:lo + ti])          # f32 bias + gelu (VPU/EUP)
        acc = acc + jnp.dot(h.astype(jnp.bfloat16), wproj_ref[lo:lo + ti, :],
                            preferred_element_type=jnp.float32)

    # TODO(synk): resid dropout omitted (eval-mode identity).
    o_ref[...] = (acc + bproj_ref[...]).astype(o_ref.dtype)


def _mlp_stream_kernel(x_ref, wfc_ref, bfc_ref, wproj_ref, bproj_ref, o_ref):
    """Streaming fallback. Grid = (M // tm, I // ti); axis 1 is the c_proj reduction.

    The f32 output block has a constant index over axis 1, so it stays
    VMEM-resident and doubles as the accumulator (no scratch needed).
    """
    i = pl.program_id(1)

    @pl.when(i == 0)
    def _():
        o_ref[...] = jnp.zeros_like(o_ref)

    x = x_ref[...].astype(jnp.bfloat16)          # x block index constant over i -> no re-DMA
    h = jnp.dot(x, wfc_ref[...], preferred_element_type=jnp.float32)
    h = _gelu_new(h + bfc_ref[...])
    # TODO(synk): consider pipeline_mode=pl.Buffered(3) on the weight BlockSpecs
    # to hide weight DMA bubbles at m-tile boundaries (mainly helps v5e).
    o_ref[...] += jnp.dot(h.astype(wproj_ref.dtype), wproj_ref[...],
                          preferred_element_type=jnp.float32)

    @pl.when(i == pl.num_programs(1) - 1)
    def _():
        # TODO(synk): resid dropout omitted (eval-mode identity).
        o_ref[...] += bproj_ref[...]


# ----------------------------------------------------------------------------
# Planning helpers
# ----------------------------------------------------------------------------

_TM_CANDIDATES = (1024, 512, 256, 128, 64, 32, 16, 8)
_TI_CANDIDATES = (1536, 1024, 768, 512, 384, 256, 128)


def _round_up(x, m):
    return (x + m - 1) // m * m


def _vmem_budget_bytes():
    try:
        cap = int(pltpu.get_tpu_info().vmem_capacity_bytes)
    except Exception:
        cap = 64 * 1024 * 1024  # conservative: v7x physical VMEM per TensorCore
    # ~96 MiB on 128-MiB parts (v5e/v6e), ~48 MiB on v7x.
    return min(int(cap * 0.75), 100 * 1024 * 1024)


def _resident_vmem_bytes(tm, ti, C, I):
    weights = 2 * (C * I + I * C) * 2            # bf16, assume double-buffered
    biases = 2 * (I + C) * 4
    x_io = 2 * tm * C * 4 + 2 * tm * C * 4       # f32 x tile + f32 out tile, 2 bufs each
    work = 2 * tm * ti * 4 + 2 * tm * C * 4      # gelu chunk temps + accumulator headroom
    return weights + biases + x_io + work


def _stream_vmem_bytes(tm, ti, C, I):
    weights = 2 * (C * ti + ti * C) * 2
    biases = 2 * (ti + C) * 4
    x_io = 2 * tm * C * 4 + 2 * tm * C * 4
    work = 2 * tm * ti * 4
    return weights + biases + x_io + work


def _choose_ti(I):
    for t in _TI_CANDIDATES:
        if I % t == 0:
            return t
    return I


def _choose_tm(M, fits):
    """Largest row tile that fits VMEM; prefer exact divisors, else pad M."""
    fitting = [t for t in _TM_CANDIDATES if fits(t)]
    if not fitting:
        return None, None
    tm_max = fitting[0]
    for t in fitting:
        if M % t == 0:
            return t, M
    # No clean divisor: pad M (bounded tile, never the silent tm=M blowup).
    tm = min(tm_max, 256, _round_up(M, 8))
    return tm, _round_up(M, tm)


# ----------------------------------------------------------------------------
# Public API
# ----------------------------------------------------------------------------

def prepare_gpt2_mlp_params(w_fc, b_fc, w_proj, b_proj):
    """Cast weights ONCE at model-load time (bf16 MXU operands, f32 biases)."""
    return dict(
        w_fc=jnp.asarray(w_fc, jnp.bfloat16),
        b_fc=jnp.asarray(b_fc, jnp.float32).reshape(1, -1),
        w_proj=jnp.asarray(w_proj, jnp.bfloat16),
        b_proj=jnp.asarray(b_proj, jnp.float32).reshape(1, -1),
    )


@functools.partial(jax.jit, static_argnames=("force_streaming",))
def gpt2_mlp(x, params, *, force_streaming=False):
    """x: (B, T, C); params from prepare_gpt2_mlp_params. Returns (B, T, C)."""
    B, T, C = x.shape
    w_fc, b_fc = params["w_fc"], params["b_fc"]
    w_proj, b_proj = params["w_proj"], params["b_proj"]
    I = w_fc.shape[1]
    assert w_fc.shape == (C, I) and w_proj.shape == (I, C)
    assert b_fc.shape == (1, I) and b_proj.shape == (1, C)

    M = B * T
    budget = _vmem_budget_bytes()
    ti = _choose_ti(I)

    use_resident = not force_streaming
    if use_resident:
        tm, M_pad = _choose_tm(M, lambda t: _resident_vmem_bytes(t, ti, C, I) <= budget)
        use_resident = tm is not None
    if not use_resident:
        tm, M_pad = _choose_tm(M, lambda t: _stream_vmem_bytes(t, ti, C, I) <= budget)
        if tm is None:
            raise ValueError("GPT2MLP shapes too large for the VMEM budget")

    xf = x.reshape(M, C).astype(jnp.float32)
    if M_pad != M:
        xf = jnp.pad(xf, ((0, M_pad - M), (0, 0)))

    if use_resident:
        kernel = functools.partial(_mlp_resident_kernel, ti=ti)
        grid = (M_pad // tm,)
        in_specs = [
            pl.BlockSpec((tm, C), lambda m: (m, 0)),   # x row tile (f32, cast in-kernel)
            pl.BlockSpec((C, I), lambda m: (0, 0)),    # W_fc: VMEM-resident, fetched once
            pl.BlockSpec((1, I), lambda m: (0, 0)),    # b_fc
            pl.BlockSpec((I, C), lambda m: (0, 0)),    # W_proj: VMEM-resident
            pl.BlockSpec((1, C), lambda m: (0, 0)),    # b_proj
        ]
        out_spec = pl.BlockSpec((tm, C), lambda m: (m, 0))
        # TODO(synk): on v7x, verify this axis is sharded across both TensorCores;
        # switch to pltpu.CORE_PARALLEL if the profile shows a single TC active.
        dims = ("parallel",)
    else:
        kernel = _mlp_stream_kernel
        grid = (M_pad // tm, I // ti)
        in_specs = [
            pl.BlockSpec((tm, C), lambda m, i: (m, 0)),    # x row tile
            pl.BlockSpec((C, ti), lambda m, i: (0, i)),    # W_fc column block
            pl.BlockSpec((1, ti), lambda m, i: (0, i)),    # b_fc column block
            pl.BlockSpec((ti, C), lambda m, i: (i, 0)),    # W_proj row block
            pl.BlockSpec((1, C), lambda m, i: (0, 0)),     # b_proj (constant)
        ]
        out_spec = pl.BlockSpec((tm, C), lambda m, i: (m, 0))
        dims = ("parallel", "arbitrary")

    out = pl.pallas_call(
        kernel,
        out_shape=jax.ShapeDtypeStruct((M_pad, C), jnp.float32),
        grid_spec=pltpu.PrefetchScalarGridSpec(
            num_scalar_prefetch=0,
            grid=grid,
            in_specs=in_specs,
            out_specs=out_spec,
        ),
        compiler_params=pltpu.CompilerParams(
            dimension_semantics=dims,
            vmem_limit_bytes=budget,
        ),
    )(xf, w_fc, b_fc, w_proj, b_proj)

    out = out[:M].reshape(B, T, C)
    return out.astype(x.dtype)


# ----------------------------------------------------------------------------
# Reference + demo
# ----------------------------------------------------------------------------

def _reference(x, w_fc, b_fc, w_proj, b_proj):
    """Plain-JAX f32 reference mirroring the PyTorch forward (dropout = identity)."""
    h = x @ w_fc + b_fc
    h = _gelu_new(h)
    return h @ w_proj + b_proj


if __name__ == "__main__":
    # Small GPT-2-like config: n_embd=64, n_inner=None -> intermediate=4*64=256,
    # seq=8, batch=2. (Real GPT-2 base is C=768, I=3072, T=1024.)
    B, T, C = 2, 8, 64
    I = 4 * C

    key = jax.random.PRNGKey(0)
    kx, k1, k2, k3, k4 = jax.random.split(key, 5)
    x = jax.random.normal(kx, (B, T, C), dtype=jnp.float32)
    w_fc = jax.random.normal(k1, (C, I), dtype=jnp.float32) * 0.02
    b_fc = jax.random.normal(k2, (I,), dtype=jnp.float32) * 0.02
    w_proj = jax.random.normal(k3, (I, C), dtype=jnp.float32) * 0.02
    b_proj = jax.random.normal(k4, (C,), dtype=jnp.float32) * 0.02

    params = prepare_gpt2_mlp_params(w_fc, b_fc, w_proj, b_proj)  # cast once, not per call
    ref = _reference(x, w_fc, b_fc, w_proj, b_proj)

    # Primary path: weights VMEM-resident.
    out = jax.block_until_ready(gpt2_mlp(x, params))
    assert out.shape == (B, T, C)
    assert jnp.allclose(out, ref, atol=1e-2, rtol=1e-2), "resident path mismatch vs reference"

    # Fallback path: I-tiled weight streaming (used when weights exceed the VMEM budget).
    out_s = jax.block_until_ready(gpt2_mlp(x, params, force_streaming=True))
    assert out_s.shape == (B, T, C)
    assert jnp.allclose(out_s, ref, atol=1e-2, rtol=1e-2), "streaming path mismatch vs reference"

    print("KERNEL_OK")
</pallas_src>

<mosaic_0001>
module attributes {stable_mosaic.version = 11 : i64} {
  func.func @_mlp_resident_kernel(%arg0: i32, %arg1: memref<16x64xf32, #tpu.memory_space<vmem>>, %arg2: memref<64x256xbf16, #tpu.memory_space<vmem>>, %arg3: memref<1x256xf32, #tpu.memory_space<vmem>>, %arg4: memref<256x64xbf16, #tpu.memory_space<vmem>>, %arg5: memref<1x64xf32, #tpu.memory_space<vmem>>, %arg6: memref<16x64xf32, #tpu.memory_space<vmem>>) attributes {dimension_semantics = [#tpu.dimension_semantics<parallel>], iteration_bounds = array<i64: 1>, scalar_prefetch = 0 : i64, scratch_operands = 0 : i64, tpu.core_type = #tpu.core_type<tc>, window_params = [{transform_indices = @transform_0, window_bounds = array<i64: 16, 64>}, {pipeline_mode = #tpu.pipeline_mode<synchronous>, transform_indices = @transform_1, window_bounds = array<i64: 64, 256>}, {pipeline_mode = #tpu.pipeline_mode<synchronous>, transform_indices = @transform_2, window_bounds = array<i64: 1, 256>}, {pipeline_mode = #tpu.pipeline_mode<synchronous>, transform_indices = @transform_3, window_bounds = array<i64: 256, 64>}, {pipeline_mode = #tpu.pipeline_mode<synchronous>, transform_indices = @transform_4, window_bounds = array<i64: 1, 64>}, {transform_indices = @transform_5, window_bounds = array<i64: 16, 64>}]} {
    %c0 = arith.constant 0 : index
    %c0_0 = arith.constant 0 : index
    %0 = vector.load %arg1[%c0, %c0_0] : memref<16x64xf32, #tpu.memory_space<vmem>>, vector<16x64xf32>
    %1 = arith.truncf %0 : vector<16x64xf32> to vector<16x64xbf16>
    %cst = arith.constant 0.000000e+00 : f32
    %2 = vector.broadcast %cst : f32 to vector<16x64xf32>
    %c0_1 = arith.constant 0 : index
    %c0_2 = arith.constant 0 : index
    %3 = vector.load %arg2[%c0_1, %c0_2] : memref<64x256xbf16, #tpu.memory_space<vmem>>, vector<64x256xbf16>
    %cst_3 = arith.constant dense<0.000000e+00> : vector<16x256xf32>
    %4 = tpu.matmul %1, %3, %cst_3 {dimension_numbers = #tpu.dot_dimension_numbers<[1], [0], [0], [1], [0, 0, 1, 1], [], []>} : vector<16x64xbf16>, vector<64x256xbf16>, vector<16x256xf32> -> vector<16x256xf32>
    %c0_4 = arith.constant 0 : index
    %c0_5 = arith.constant 0 : index
    %5 = vector.load %arg3[%c0_4, %c0_5] : memref<1x256xf32, #tpu.memory_space<vmem>>, vector<1x256xf32>
    %6 = vector.broadcast %5 : vector<1x256xf32> to vector<16x256xf32>
    %7 = arith.addf %4, %6 : vector<16x256xf32>
    %cst_6 = arith.constant 5.000000e-01 : f32
    %8 = vector.broadcast %cst_6 : f32 to vector<16x256xf32>
    %9 = arith.mulf %8, %7 : vector<16x256xf32>
    %cst_7 = arith.constant 0.0356774069 : f32
    %10 = vector.broadcast %cst_7 : f32 to vector<16x256xf32>
    %11 = arith.mulf %10, %7 : vector<16x256xf32>
    %12 = arith.mulf %11, %7 : vector<16x256xf32>
    %cst_8 = arith.constant 0.797884583 : f32
    %13 = vector.broadcast %cst_8 : f32 to vector<16x256xf32>
    %14 = arith.addf %13, %12 : vector<16x256xf32>
    %15 = arith.mulf %7, %14 : vector<16x256xf32>
    %16 = math.tanh %15 : vector<16x256xf32>
    %cst_9 = arith.constant 1.000000e+00 : f32
    %17 = vector.broadcast %cst_9 : f32 to vector<16x256xf32>
    %18 = arith.addf %17, %16 : vector<16x256xf32>
    %19 = arith.mulf %9, %18 : vector<16x256xf32>
    %20 = arith.truncf %19 : vector<16x256xf32> to vector<16x256xbf16>
    %c0_10 = arith.constant 0 : index
    %c0_11 = arith.constant 0 : index
    %21 = vector.load %arg4[%c0_10, %c0_11] : memref<256x64xbf16, #tpu.memory_space<vmem>>, vector<256x64xbf16>
    %cst_12 = arith.constant dense<0.000000e+00> : vector<16x64xf32>
    %22 = tpu.matmul %20, %21, %cst_12 {dimension_numbers = #tpu.dot_dimension_numbers<[1], [0], [0], [1], [0, 0, 1, 1], [], []>} : vector<16x256xbf16>, vector<256x64xbf16>, vector<16x64xf32> -> vector<16x64xf32>
    %23 = arith.addf %2, %22 : vector<16x64xf32>
    %c0_13 = arith.constant 0 : index
    %c0_14 = arith.constant 0 : index
    %24 = vector.load %arg5[%c0_13, %c0_14] : memref<1x64xf32, #tpu.memory_space<vmem>>, vector<1x64xf32>
    %25 = vector.broadcast %24 : vector<1x64xf32> to vector<16x64xf32>
    %26 = arith.addf %23, %25 : vector<16x64xf32>
    %c0_15 = arith.constant 0 : index
    %c0_16 = arith.constant 0 : index
    %27 = vector.load %arg6[%c0_15, %c0_16] : memref<16x64xf32, #tpu.memory_space<vmem>>, vector<16x64xf32>
    tpu.vector_store %arg6[%c0_15, %c0_16], %26 {strides = array<i32>} : memref<16x64xf32, #tpu.memory_space<vmem>>, vector<16x64xf32>,
    return
  }
  func.func @transform_0(%arg0: i32) -> (i32, i32) {
    %c0_i32 = arith.constant 0 : i32
    %c0_i32_0 = arith.constant 0 : i32
    return %arg0, %c0_i32 : i32, i32
  }
  func.func @transform_1(%arg0: i32) -> (i32, i32) {
    %c0_i32 = arith.constant 0 : i32
    %c0_i32_0 = arith.constant 0 : i32
    %c0_i32_1 = arith.constant 0 : i32
    return %c0_i32, %c0_i32_0 : i32, i32
  }
  func.func @transform_2(%arg0: i32) -> (i32, i32) {
    %c0_i32 = arith.constant 0 : i32
    %c0_i32_0 = arith.constant 0 : i32
    %c0_i32_1 = arith.constant 0 : i32
    return %c0_i32, %c0_i32_0 : i32, i32
  }
  func.func @transform_3(%arg0: i32) -> (i32, i32) {
    %c0_i32 = arith.constant 0 : i32
    %c0_i32_0 = arith.constant 0 : i32
    %c0_i32_1 = arith.constant 0 : i32
    return %c0_i32, %c0_i32_0 : i32, i32
  }
  func.func @transform_4(%arg0: i32) -> (i32, i32) {
    %c0_i32 = arith.constant 0 : i32
    %c0_i32_0 = arith.constant 0 : i32
    %c0_i32_1 = arith.constant 0 : i32
    return %c0_i32, %c0_i32_0 : i32, i32
  }
  func.func @transform_5(%arg0: i32) -> (i32, i32) {
    %c0_i32 = arith.constant 0 : i32
    %c0_i32_0 = arith.constant 0 : i32
    return %arg0, %c0_i32 : i32, i32
  }
}

</mosaic_0001>

<bundles_post_ra>
// kernel: gpt2_mlp.1
= control target key start
LH: loop header
LB: loop body
LE: loop exit
PB: predicated region body
PF: predicated region fallthrough
CT: control target
= control target key end

     0   :  { %v470_v2 = vmov 0   ;;  %vm85_vm0 = vcmask 523264   ;;  %s594_s0 = inlined_call_operand.vmem [shape: f32[16,64], index: 0, kind: input, shape index: {}]   ;;  %s595_s1 = inlined_call_operand.vmem [shape: bf16[64,256], index: 1, kind: input, shape index: {}]   ;;  %s596_s2 = inlined_call_operand.vmem [shape: f32[1,256], index: 2, kind: input, shape index: {}]   ;;  %s597_s3 = inlined_call_operand.vmem [shape: bf16[256,64], index: 3, kind: input, shape index: {}]   ;;  %s598_s4 = inlined_call_operand.vmem [shape: f32[1,64], index: 4, kind: input, shape index: {}]   ;;  %s599_s5 = inlined_call_operand.hbm [shape: f32[16,64], index: 5, kind: output, shape index: {}]  }
   0x1   :  { %v412_v0 = vld [vmem:[%s595_s1 + $0x34] ss:$8 sps:$4 sm:$0xff]   ;;  %v414_v1 = vld [vmem:[%s595_s1 + $0x30] ss:$8 sps:$4 sm:$0xff]   ;;  %121 = vmatprep.mubr.bf16.mxu0 %v470_v2  ;;  %v415_v3 = vld [vmem:[%s595_s1 + $0x24] ss:$8 sps:$4 sm:$0xff]  }
   0x2   :  { %97 = vmatprep.subr.bf16.mxu0 %v412_v0  ;;  %v417_v4 = vld [vmem:[%s595_s1 + $0x20] ss:$8 sps:$4 sm:$0xff]   ;;  %v418_v5 = vld [vmem:[%s595_s1 + $0x14] ss:$8 sps:$4 sm:$0xff]   ;;  %v420_v6 = vld [vmem:[%s595_s1 + $0x10] ss:$8 sps:$4 sm:$0xff]  }
   0x3   :  { %98 = vmatpush1.bf16.msra.mxu0 %v414_v1  ;;  %v421_v7 = vld [vmem:[%s595_s1 + $0x4] ss:$8 sps:$4 sm:$0xff]   ;;  %v423_v8 = vld [vmem:[%s595_s1] ss:$8 sps:$4 sm:$0xff]  }
   0x4   :  { %99 = vmatprep.subr.bf16.mxu0 %v415_v3  ;;  %v22_v9 = vld [vmem:[%s594_s0] sm:$0xff]  ;;  %v23_v10 = vld [vmem:[%s594_s0 + $0x8] sm:$0xff] }
   0x5   :  { %v24_v11 = vpack.c.bf16 %v23_v10, %v22_v9 }
   0x7   :  { %100 = vmatpush1.bf16.msra.mxu0 %v417_v4 }
   0x8   :  { %101 = vmatprep.subr.bf16.mxu0 %v418_v5 }
   0xb   :  { %102 = vmatpush1.bf16.msra.mxu0 %v420_v6 }
   0xc   :  { %103 = vmatprep.subr.bf16.mxu0 %v421_v7 }
   0xf   :  { %104 = vmatpush1.bf16.msra.mxu0 %v423_v8 }
  0x10   :  { %10 = vsyncpa [#allocation3], 0  ;;  %v424_v12 = vld [vmem:[%s597_s3 + $0x78] sm:$0xff]   ;;  %v426_v14 = vld [vmem:[%s597_s3 + $0x70] sm:$0xff]   ;;  %v35_v28 = vlaneseq  ;;  %s471_s18 = smov [#allocation2]  }
  0x11   :  { %v425_v13 = vld [vmem:[%s597_s3 + $0x38] sm:$0xff]   ;;  %386 = vmatprep.subr.bf16.mxu1 %v424_v12  ;;  %v427_v15 = vld [vmem:[%s597_s3 + $0x30] sm:$0xff]   ;;  %v428_v16 = vld [vmem:[%s597_s3 + $0x68] sm:$0xff]   ;;  %s349_s19 = sshll.u32 %s471_s18, 4  ;;  %s350_s19 = int_to_ptr.vmem [resolvable:$true] %s349_s19 }
  0x12   :  { %368 = vmatmul.mubr.msk.bf16.vlgmr.msra.gmra.mxu0 %vm85_vm0, %v24_v11  ;;  %387 = vmatpush3.bf16.msra.mxu1 %v425_v13  ;;  %v429_v17 = vld [vmem:[%s597_s3 + $0x28] sm:$0xff]   ;;  %v430_v18 = vld [vmem:[%s597_s3 + $0x60] sm:$0xff]   ;;  %v432_v20 = vld [vmem:[%s597_s3 + $0x58] sm:$0xff]   ;;  %v36_v29 = vshrl.u32 %v35_v28, 7  ;;  %s448_s20 = scalar_lea.vmem %s350_s19, 256  ;;  %p453_p1 = scmp.lt.s32.totalorder %s350_s19, %s350_s19 }
  0x13   :  { %388 = vmatprep.subr.bf16.mxu1 %v426_v14  ;;  %v431_v19 = vld [vmem:[%s597_s3 + $0x20] sm:$0xff]   ;;  %v433_v21 = vld [vmem:[%s597_s3 + $0x18] sm:$0xff]   ;;  %v434_v22 = vld [vmem:[%s597_s3 + $0x50] sm:$0xff]   ;;  %p449_p0 = scmp.ne.s32.totalorder %s350_s19, %s448_s20  ;;  %p454_p2 = scmp.lt.s32.totalorder %s448_s20, %s448_s20 }
  0x14   :  { %v435_v23 = vld [vmem:[%s597_s3 + $0x10] sm:$0xff]   ;;  %v436_v24 = vld [vmem:[%s597_s3 + $0x48] sm:$0xff]   ;;  %v438_v26 = vld [vmem:[%s597_s3 + $0x40] sm:$0xff]   ;;  %v37_v30 = vsub.s32 0, %v36_v29  ;;  %v41_v32 = vsub.s32 1, %v36_v29 }
  0x15   :  { %v437_v25 = vld [vmem:[%s597_s3 + $0x8] sm:$0xff]   ;;  %v439_v27 = vld [vmem:[%s597_s3] sm:$0xff]   ;;  %p455_p3 = por %p454_p2, %p453_p1 }
  0x16   :  { %389 = vmatpush3.bf16.msra.mxu1 %v427_v15  ;;  %v33_v31 = vld [vmem:[%s596_s2] sm:$0x3] }
  0x17   :  { %390 = vmatprep.subr.bf16.mxu1 %v428_v16  ;;  %v38_v33 = vrot.slane %v33_v31, %v37_v30  ;;  %v42_v34 = vrot.slane %v33_v31, %v41_v32  ;;  %v369_v14 = vld [vmem:[%s598_s4] ss:$0 sm:$0xff]  ;;  %p456_p4 = pnand %p455_p3, %p449_p0 }
  0x1a   :  { %391 = vmatpush3.bf16.msra.mxu1 %v429_v17 }
  0x1b   :  { %392 = vmatprep.subr.bf16.mxu1 %v430_v18 }
  0x1e   :  { %393 = vmatpush3.bf16.msra.mxu1 %v431_v19 }
  0x1f   :  { %394 = vmatprep.subr.bf16.mxu1 %v432_v20 }
  0x22   :  { %395 = vmatpush3.bf16.msra.mxu1 %v433_v21 }
  0x23   :  { %396 = vmatprep.subr.bf16.mxu1 %v434_v22 }
  0x26   :  { %397 = vmatpush3.bf16.msra.mxu1 %v435_v23 }
  0x27   :  { %398 = vmatprep.subr.bf16.mxu1 %v436_v24 }
  0x2a   :  { %399 = vmatpush3.bf16.msra.mxu1 %v437_v25 }
  0x2b   :  { %400 = vmatprep.subr.bf16.mxu1 %v438_v26 }
  0x2e   :  { %401 = vmatpush3.bf16.msra.mxu1 %v439_v27 }
  0xd2   :  { %v123_v35 = vpop.f32.mrf.mxu0 }
  0xd3   :  { %v124_v36 = vadd.f32 %v123_v35, %v38_v33 }
  0xd4   :  { %v125_v37 = vpop.f32.mrf.mxu0 }
  0xd5   :  { %v136_v38 = vmul.f32 0.035677407, %v124_v36  ;;  %v126_v39 = vadd.f32 %v125_v37, %v42_v34  ;;  %v132_v6 = vmul.f32 0.5, %v124_v36 }
  0xd6   :  { %v127_v40 = vpop.f32.mrf.mxu0 }
  0xd7   :  { %v140_v41 = vmul.f32 %v136_v38, %v124_v36  ;;  %v137_v42 = vmul.f32 0.035677407, %v126_v39  ;;  %v128_v43 = vadd.f32 %v127_v40, %v38_v33  ;;  %v133_v3 = vmul.f32 0.5, %v126_v39 }
  0xd8   :  { %v129_v44 = vpop.f32.mrf.mxu0 }
  0xd9   :  { %v144_v45 = vadd.f32 0.7978846, %v140_v41  ;;  %v141_v46 = vmul.f32 %v137_v42, %v126_v39  ;;  %v138_v47 = vmul.f32 0.035677407, %v128_v43  ;;  %v130_v48 = vadd.f32 %v129_v44, %v42_v34 }
  0xda   :  { %v134_v1 = vmul.f32 0.5, %v128_v43 }
  0xdb   :  { %v145_v49 = vadd.f32 0.7978846, %v141_v46  ;;  %v142_v50 = vmul.f32 %v138_v47, %v128_v43  ;;  %v139_v51 = vmul.f32 0.035677407, %v130_v48  ;;  %v148_v52 = vmul.f32 %v144_v45, %v124_v36 }
  0xdc   :  { %v135_v4 = vmul.f32 0.5, %v130_v48 }
  0xdd   :  { %v146_v53 = vadd.f32 0.7978846, %v142_v50  ;;  %v143_v54 = vmul.f32 %v139_v51, %v130_v48  ;;  %v149_v55 = vmul.f32 %v145_v49, %v126_v39 }
  0xdf   :  { %v150_v56 = vmul.f32 %v146_v53, %v128_v43  ;;  %v147_v57 = vadd.f32 0.7978846, %v143_v54  ;;  %440 = vtanh.f32 %v149_v55 }
  0xe0   :  { %442 = vtanh.f32 %v148_v52 }
  0xe1   :  { %444 = vtanh.f32 %v150_v56  ;;  %v151_v58 = vmul.f32 %v147_v57, %v130_v48 }
  0xe3   :  { %446 = vtanh.f32 %v151_v58 }
  0xec   :  { %v441_v59 = vpop.eup %440 }
  0xed   :  { %v443_v60 = vpop.eup %442  ;;  %v157_v62 = vadd.f32 1.0, %v441_v59 }
  0xee   :  { %v445_v61 = vpop.eup %444  ;;  %v156_v2 = vadd.f32 1.0, %v443_v60 }
  0xef   :  { %v158_v63 = vadd.f32 1.0, %v445_v61  ;;  %v161_v8 = vmul.f32 %v157_v62, %v133_v3 }
  0xf0   :  { %v447_v0 = vpop.eup %446  ;;  %v160_v10 = vmul.f32 %v156_v2, %v132_v6 }
  0xf1   :  { %v159_v5 = vadd.f32 1.0, %v447_v0  ;;  %v162_v7 = vmul.f32 %v158_v63, %v134_v1 }
  0xf3   :  { %v163_v9 = vmul.f32 %v159_v5, %v135_v4  ;;  %v164_v12 = vpack.c.bf16 %v162_v7, %v160_v10 }
  0xf5   :  { %v165_v11 = vpack.c.bf16 %v163_v9, %v161_v8 }
  0xf7   :  { %333 = vmatprep.mubr.bf16.mxu1 %v165_v11 }
  0xf8   :  { %334 = vmatmul.mubr.bf16.vlgmr.msra.gmra.mxu1 %v164_v12 }
 0x1b8   :  { %v402_v13 = vpop.f32.mrf.mxu1 }
 0x1ba   :  { %v403_v15 = vpop.f32.mrf.mxu1 }
 0x1bb   :  { %v404_v16 = vadd.f32 %v403_v15, %v402_v13 }
 0x1bc   :  { %v405_v17 = vpop.f32.mrf.mxu1 }
 0x1bd   :  { %v336_v18 = vadd.f32 %v404_v16, %v369_v14 }
 0x1be   :  { %v406_v19 = vpop.f32.mrf.mxu1 }
 0x1bf   :  { %342 = vst.msk [vmem:[#allocation2] sm:$0xff] %vm85_vm0, %v336_v18  ;;  %v407_v20 = vadd.f32 %v406_v19, %v405_v17 }
 0x1c1   :  { %v339_v21 = vadd.f32 %v407_v20, %v369_v14 }
 0x1c3   :  { %343 = vst.msk [vmem:[#allocation2 + $0x8] sm:$0xff] %vm85_vm0, %v339_v21 }
 0x1c4   :  { %459 = shalt.err (!%p456_p4)
}
 0x1c5   :  { %s472_s4 = smov 128   ;;  %s473_s21 = smov 8  }
 0x1c6   :  { %355 = dma.vmem_to_hbm [thread:$0]  %s350_s19, 256, %s599_s5, [#allocation3], %s472_s4, %s472_s4, %s473_s21  }
 0x1c7   :  { %468 = dma.done.wait [#allocation3], 256  }
 0x1c8   :  { %469 = vsyncadd [#allocation3], 4294967040 }
 0x1c9   :  { %359 = vsyncpa [#allocation3], 1 }

</bundles_post_ra>
